<compile_context>
chip_gen: v5e
topology: v5e:2x2
jax: 0.10.0
libtpu: 0.0.40
codegen_flags: <defaults>
</compile_context>

<pallas_src>
import math
from typing import NamedTuple, Optional

import jax
import jax.numpy as jnp
from jax.experimental import pallas as pl
from jax.experimental.pallas import tpu as pltpu


def _round_up(v, m):
    return ((v + m - 1) // m) * m


def _pick_tile(dim, max_tile, align):
    """Tile size: multiple of `align`, <= max(max_tile, aligned dim), chosen so
    the padded remainder of `dim` is < `align` per block (divisor-aware)."""
    dim_a = _round_up(max(int(dim), 1), align)
    if dim_a <= max_tile:
        return dim_a
    n_blocks = -(-dim_a // max_tile)                    # ceil
    return _round_up(-(-dim_a // n_blocks), align)      # ceil then align


# ----------------------------------------------------------------------------
# Kernels
# ----------------------------------------------------------------------------

def _linear_bias_kernel(x_ref, w_ref, b_ref, o_ref, acc_ref):
    # x_ref: (tm, tk)  w_ref: (tk, tn) pre-transposed  b_ref: (1, tn) f32
    # o_ref: (tm, tn)  acc_ref: (tm, tn) f32 scratch
    k = pl.program_id(2)
    partial = jnp.dot(x_ref[...], w_ref[...], preferred_element_type=jnp.float32)

    @pl.when(k == 0)
    def _():                       # first k-step: write, don't zero+add
        acc_ref[...] = partial

    @pl.when(k > 0)
    def _():
        acc_ref[...] += partial

    @pl.when(k == pl.num_programs(2) - 1)
    def _():
        o_ref[...] = (acc_ref[...] + b_ref[...]).astype(o_ref.dtype)


def _linear_nobias_kernel(x_ref, w_ref, o_ref, acc_ref):
    k = pl.program_id(2)
    partial = jnp.dot(x_ref[...], w_ref[...], preferred_element_type=jnp.float32)

    @pl.when(k == 0)
    def _():
        acc_ref[...] = partial

    @pl.when(k > 0)
    def _():
        acc_ref[...] += partial

    @pl.when(k == pl.num_programs(2) - 1)
    def _():
        o_ref[...] = acc_ref[...].astype(o_ref.dtype)


# ----------------------------------------------------------------------------
# Parameter preparation (done ONCE, not per forward call)
# ----------------------------------------------------------------------------

class PreparedLinear(NamedTuple):
    w_t: jax.Array                 # (k_pad, n_pad) = pre-transposed, pre-padded
    bias: Optional[jax.Array]      # (1, n_pad) float32, or None
    in_features: int
    out_features: int
    tk: int
    tn: int


def prepare_xavier_linear(weight, bias=None, *, compute_dtype=None,
                          tk_max=1024, tn_max=512):
    """weight: (out_features, in_features) PyTorch layout.  Transposes + pads the
    weight once so the forward pass never touches the full weight outside the
    kernel.  compute_dtype=jnp.bfloat16 enables the bf16 MXU path."""
    out_features, in_features = weight.shape
    tk = _pick_tile(in_features, tk_max, 128)
    tn = _pick_tile(out_features, tn_max, 128)
    k_pad = _round_up(in_features, tk)
    n_pad = _round_up(out_features, tn)

    w_dtype = compute_dtype if compute_dtype is not None else weight.dtype
    w_t = jnp.asarray(weight, w_dtype).T                # (K, N)
    if (k_pad, n_pad) != (in_features, out_features):
        w_t = jnp.pad(w_t, ((0, k_pad - in_features), (0, n_pad - out_features)))

    b_p = None
    if bias is not None:
        b_p = jnp.asarray(bias, jnp.float32).reshape(1, out_features)
        if n_pad != out_features:
            b_p = jnp.pad(b_p, ((0, 0), (0, n_pad - out_features)))

    return PreparedLinear(w_t, b_p, int(in_features), int(out_features),
                          int(tk), int(tn))


# ----------------------------------------------------------------------------
# Forward
# ----------------------------------------------------------------------------

def xavier_linear_forward(x, params: PreparedLinear, *, tm_max=512):
    """y = x @ weight.T (+ bias) over the last axis of x, via Pallas."""
    p = params
    assert x.shape[-1] == p.in_features
    lead_shape = x.shape[:-1]
    m = int(math.prod(lead_shape)) if lead_shape else 1
    out_dtype = x.dtype
    cdtype = p.w_t.dtype

    k_pad, n_pad = p.w_t.shape
    tk, tn = p.tk, p.tn

    tm = _pick_tile(m, tm_max, 8)
    m_pad = _round_up(m, tm)

    # Megacore (v7x has 2 TensorCores): make sure the parallel axes have >= 2
    # blocks when possible so one core is not idle for small-M shapes.
    if (m_pad // tm) == 1 and (n_pad // tn) == 1 and tn >= 256 and tn % 256 == 0:
        tn = tn // 2

    x2d = x.reshape(m, p.in_features)
    if x2d.dtype != cdtype:
        x2d = x2d.astype(cdtype)
    if (m_pad, k_pad) != (m, p.in_features):
        x2d = jnp.pad(x2d, ((0, m_pad - m), (0, k_pad - p.in_features)))

    grid = (m_pad // tm, n_pad // tn, k_pad // tk)

    x_spec = pl.BlockSpec((tm, tk), lambda i, j, k: (i, k))
    w_spec = pl.BlockSpec((tk, tn), lambda i, j, k: (k, j))
    w_bufs = 2
    # GEMV-like regime: HBM-bound on streaming W -> deepen the weight pipeline.
    if m_pad <= 256 and (n_pad // tn) * (k_pad // tk) >= 3:
        try:
            w_spec = pl.BlockSpec((tk, tn), lambda i, j, k: (k, j),
                                  pipeline_mode=pl.Buffered(3))
            w_bufs = 3
        except (TypeError, AttributeError):
            pass  # older API: fall back to default double-buffering

    in_specs = [x_spec, w_spec]
    args = [x2d, p.w_t]
    if p.bias is not None:
        in_specs.append(pl.BlockSpec((1, tn), lambda i, j, k: (0, j)))
        args.append(p.bias)
        kernel = _linear_bias_kernel
    else:
        kernel = _linear_nobias_kernel

    itemsize = jnp.dtype(cdtype).itemsize
    out_itemsize = jnp.dtype(out_dtype).itemsize

    # VMEM budget: double-buffered inputs/outputs + f32 accumulator scratch.
    vmem_bytes = (2 * tm * tk * itemsize
                  + w_bufs * tk * tn * itemsize
                  + 2 * tm * tn * out_itemsize
                  + tm * tn * 4
                  + (2 * tn * 4 if p.bias is not None else 0))
    # Cap at 48 MiB -> safe headroom even on v7x (64 MiB VMEM per TensorCore);
    # explicit limit also lifts v5e's 16 MiB scoped-VMEM default.
    vmem_limit = min(max(2 * vmem_bytes + (8 << 20), 32 << 20), 48 << 20)

    # Bytes accessed including tile re-streaming: x is read once per N-block,
    # W once per M-block, output written once.
    bytes_accessed = ((n_pad // tn) * m_pad * k_pad * itemsize
                      + (m_pad // tm) * k_pad * n_pad * itemsize
                      + m_pad * n_pad * out_itemsize
                      + ((m_pad // tm) * n_pad * 4 if p.bias is not None else 0))
    cost = pl.CostEstimate(flops=2 * m_pad * n_pad * k_pad,
                           transcendentals=0,
                           bytes_accessed=bytes_accessed)

    out2d = pl.pallas_call(
        kernel,
        out_shape=jax.ShapeDtypeStruct((m_pad, n_pad), out_dtype),
        grid=grid,
        in_specs=in_specs,
        out_specs=pl.BlockSpec((tm, tn), lambda i, j, k: (i, j)),
        scratch_shapes=[pltpu.VMEM((tm, tn), jnp.float32)],
        compiler_params=pltpu.CompilerParams(
            dimension_semantics=("parallel", "parallel", "arbitrary"),
            vmem_limit_bytes=int(vmem_limit)),
        cost_estimate=cost,
    )(*args)

    if (m_pad, n_pad) != (m, p.out_features):
        out2d = out2d[:m, :p.out_features]
    return out2d.reshape(*lead_shape, p.out_features)


# ----------------------------------------------------------------------------
# Parameter init matching the PyTorch module (host-side, not a kernel)
# ----------------------------------------------------------------------------

def init_xavier_linear_params(key, in_features, out_features, bias=True,
                              dtype=jnp.float32):
    """weight: Xavier (Glorot) normal, std = sqrt(2 / (fan_in + fan_out));
       bias:   PyTorch nn.Linear default, U(-1/sqrt(fan_in), 1/sqrt(fan_in))."""
    kw, kb = jax.random.split(key)
    std = math.sqrt(2.0 / float(in_features + out_features))
    weight = std * jax.random.normal(kw, (out_features, in_features), dtype=dtype)
    if bias:
        bound = 1.0 / math.sqrt(in_features)
        b = jax.random.uniform(kb, (out_features,), dtype=dtype,
                               minval=-bound, maxval=bound)
    else:
        b = None
    return weight, b


if __name__ == "__main__":
    key = jax.random.PRNGKey(0)
    k_x, k_p = jax.random.split(key)

    batch, seq, in_features, out_features = 2, 8, 32, 48

    x = jax.random.normal(k_x, (batch, seq, in_features), dtype=jnp.float32)
    weight, bias = init_xavier_linear_params(k_p, in_features, out_features,
                                             bias=True)
    y_ref = x @ weight.T + bias

    # f32 path (exact module semantics)
    params = prepare_xavier_linear(weight, bias)
    y = jax.block_until_ready(xavier_linear_forward(x, params))
    assert y.shape == (batch, seq, out_features)
    assert jnp.allclose(y, y_ref, atol=1e-5, rtol=1e-5)

    # no-bias path
    params_nb = prepare_xavier_linear(weight, None)
    y_nb = jax.block_until_ready(xavier_linear_forward(x, params_nb))
    assert jnp.allclose(y_nb, x @ weight.T, atol=1e-5, rtol=1e-5)

    # bf16 MXU path (opt-in; f32 accumulation, f32 output)
    params_bf16 = prepare_xavier_linear(weight, bias,
                                        compute_dtype=jnp.bfloat16)
    y_bf = jax.block_until_ready(xavier_linear_forward(x, params_bf16))
    assert y_bf.dtype == jnp.float32
    assert jnp.allclose(y_bf, y_ref, atol=1e-1, rtol=5e-2)

    print("KERNEL_OK")
</pallas_src>

<mosaic_0001>
module attributes {stable_mosaic.version = 11 : i64} {
  func.func @_linear_bias_kernel(%arg0: i32, %arg1: i32, %arg2: i32, %arg3: memref<16x128xf32, #tpu.memory_space<vmem>>, %arg4: memref<128x128xf32, #tpu.memory_space<vmem>>, %arg5: memref<1x128xf32, #tpu.memory_space<vmem>>, %arg6: memref<16x128xf32, #tpu.memory_space<vmem>>, %arg7: memref<16x128xf32, #tpu.memory_space<vmem>>) attributes {dimension_semantics = [#tpu.dimension_semantics<parallel>, #tpu.dimension_semantics<parallel>, #tpu.dimension_semantics<arbitrary>], iteration_bounds = array<i64: 1, 1, 1>, scalar_prefetch = 0 : i64, scratch_operands = 1 : i64, tpu.core_type = #tpu.core_type<tc>, window_params = [{transform_indices = @transform_0, window_bounds = array<i64: 16, 128>}, {transform_indices = @transform_1, window_bounds = array<i64: 128, 128>}, {transform_indices = @transform_2, window_bounds = array<i64: 1, 128>}, {transform_indices = @transform_3, window_bounds = array<i64: 16, 128>}]} {
    %c0 = arith.constant 0 : index
    %c0_0 = arith.constant 0 : index
    %0 = vector.load %arg3[%c0, %c0_0] : memref<16x128xf32, #tpu.memory_space<vmem>>, vector<16x128xf32>
    %c0_1 = arith.constant 0 : index
    %c0_2 = arith.constant 0 : index
    %1 = vector.load %arg4[%c0_1, %c0_2] : memref<128x128xf32, #tpu.memory_space<vmem>>, vector<128x128xf32>
    %cst = arith.constant dense<0.000000e+00> : vector<16x128xf32>
    %2 = tpu.matmul %0, %1, %cst {dimension_numbers = #tpu.dot_dimension_numbers<[1], [0], [0], [1], [0, 0, 1, 1], [], []>} : vector<16x128xf32>, vector<128x128xf32>, vector<16x128xf32> -> vector<16x128xf32>
    %c0_i32 = arith.constant 0 : i32
    %3 = arith.cmpi eq, %arg2, %c0_i32 : i32
    %4 = arith.extui %3 : i1 to i32
    %c0_i32_3 = arith.constant 0 : i32
    %5 = arith.cmpi ne, %4, %c0_i32_3 : i32
    scf.if %5 {
      %c0_8 = arith.constant 0 : index
      %c0_9 = arith.constant 0 : index
      %12 = vector.load %arg7[%c0_8, %c0_9] : memref<16x128xf32, #tpu.memory_space<vmem>>, vector<16x128xf32>
      tpu.vector_store %arg7[%c0_8, %c0_9], %2 {strides = array<i32>} : memref<16x128xf32, #tpu.memory_space<vmem>>, vector<16x128xf32>,
    } else {
    }
    %c0_i32_4 = arith.constant 0 : i32
    %6 = arith.cmpi sgt, %arg2, %c0_i32_4 : i32
    %7 = arith.extui %6 : i1 to i32
    %c0_i32_5 = arith.constant 0 : i32
    %8 = arith.cmpi ne, %7, %c0_i32_5 : i32
    scf.if %8 {
      %c0_8 = arith.constant 0 : index
      %c0_9 = arith.constant 0 : index
      %12 = vector.load %arg7[%c0_8, %c0_9] : memref<16x128xf32, #tpu.memory_space<vmem>>, vector<16x128xf32>
      %13 = arith.addf %12, %2 : vector<16x128xf32>
      %c0_10 = arith.constant 0 : index
      %c0_11 = arith.constant 0 : index
      %14 = vector.load %arg7[%c0_10, %c0_11] : memref<16x128xf32, #tpu.memory_space<vmem>>, vector<16x128xf32>
      tpu.vector_store %arg7[%c0_10, %c0_11], %13 {strides = array<i32>} : memref<16x128xf32, #tpu.memory_space<vmem>>, vector<16x128xf32>,
    } else {
    }
    %c0_i32_6 = arith.constant 0 : i32
    %9 = arith.cmpi eq, %arg2, %c0_i32_6 : i32
    %10 = arith.extui %9 : i1 to i32
    %c0_i32_7 = arith.constant 0 : i32
    %11 = arith.cmpi ne, %10, %c0_i32_7 : i32
    scf.if %11 {
      %c0_8 = arith.constant 0 : index
      %c0_9 = arith.constant 0 : index
      %12 = vector.load %arg7[%c0_8, %c0_9] : memref<16x128xf32, #tpu.memory_space<vmem>>, vector<16x128xf32>
      %c0_10 = arith.constant 0 : index
      %c0_11 = arith.constant 0 : index
      %13 = vector.load %arg5[%c0_10, %c0_11] : memref<1x128xf32, #tpu.memory_space<vmem>>, vector<1x128xf32>
      %14 = vector.broadcast %13 : vector<1x128xf32> to vector<16x128xf32>
      %15 = arith.addf %12, %14 : vector<16x128xf32>
      %c0_12 = arith.constant 0 : index
      %c0_13 = arith.constant 0 : index
      %16 = vector.load %arg6[%c0_12, %c0_13] : memref<16x128xf32, #tpu.memory_space<vmem>>, vector<16x128xf32>
      tpu.vector_store %arg6[%c0_12, %c0_13], %15 {strides = array<i32>} : memref<16x128xf32, #tpu.memory_space<vmem>>, vector<16x128xf32>,
    } else {
    }
    return
  }
  func.func @transform_0(%arg0: i32, %arg1: i32, %arg2: i32) -> (i32, i32) {
    %c0_i32 = arith.constant 0 : i32
    return %arg0, %arg2 : i32, i32
  }
  func.func @transform_1(%arg0: i32, %arg1: i32, %arg2: i32) -> (i32, i32) {
    %c0_i32 = arith.constant 0 : i32
    return %arg2, %arg1 : i32, i32
  }
  func.func @transform_2(%arg0: i32, %arg1: i32, %arg2: i32) -> (i32, i32) {
    %c0_i32 = arith.constant 0 : i32
    %c0_i32_0 = arith.constant 0 : i32
    return %c0_i32, %arg1 : i32, i32
  }
  func.func @transform_3(%arg0: i32, %arg1: i32, %arg2: i32) -> (i32, i32) {
    %c0_i32 = arith.constant 0 : i32
    return %arg0, %arg1 : i32, i32
  }
}

</mosaic_0001>

<bundles_post_ra>
// kernel: tpu_custom_call.1
= control target key start
LH: loop header
LB: loop body
LE: loop exit
PB: predicated region body
PF: predicated region fallthrough
CT: control target
= control target key end

     0   :  { %8 = vsyncpa [#allocation4], 0  ;;  %s283_s0 = inlined_call_operand.hbm [shape: f32[16,128], index: 0, kind: input, shape index: {}]   ;;  %s284_s1 = inlined_call_operand.hbm [shape: f32[128,128], index: 1, kind: input, shape index: {}]   ;;  %s285_s2 = inlined_call_operand.vmem [shape: f32[1,128], index: 2, kind: input, shape index: {}]   ;;  %s286_s3 = inlined_call_operand.hbm [shape: f32[16,128], index: 3, kind: output, shape index: {}]  }
   0x1   :  { %9 = vsyncpa [#allocation7], 0 }
   0x2   :  { %10 = vsyncpa [#allocation5], 0  ;;  %s15_s14 = sshll.u32 %s283_s0, 4  ;;  %s237_s15 = smov [#allocation3]   ;;  %s16_s14 = int_to_ptr.hbm [resolvable:$true] %s15_s14 }
   0x3   :  { %s17_s16 = sshll.u32 %s237_s15, 4  ;;  %s28_s19 = sshll.u32 %s284_s1, 4  ;;  %s18_s16 = int_to_ptr.vmem [resolvable:$true] %s17_s16  ;;  %s29_s19 = int_to_ptr.hbm [resolvable:$true] %s28_s19 }
   0x4   :  { %s238_s20 = smov 128   ;;  %s239_s21 = smov 8  }
   0x5   :  { %23 = dma.hbm_to_vmem [thread:$0]  %s16_s14, 256, %s18_s16, [#allocation4], %s238_s20, %s238_s20, %s239_s21  }
   0x6   :  { %s240_s22 = smov [#allocation6]  }
   0x7   :  { %s30_s23 = sshll.u32 %s240_s22, 4  ;;  %s31_s23 = int_to_ptr.vmem [resolvable:$true] %s30_s23 }
   0x8   :  { %36 = dma.hbm_to_vmem [thread:$0]  %s29_s19, 2048, %s31_s23, [#allocation7], %s238_s20, %s238_s20, %s239_s21  }
   0x9   :  { %231 = dma.done.wait [#allocation4], 256  }
   0xa   :  { %232 = vsyncadd [#allocation4], 4294967040 }
   0xb   :  { %233 = dma.done.wait [#allocation7], 2048  }
   0xc   :  { %234 = vsyncadd [#allocation7], 4294965248  ;;  %v64_v0 = vld [vmem:[#allocation6 + $0x78] sm:$0xff]  ;;  %v63_v1 = vld [vmem:[#allocation6 + $0x70] sm:$0xff]  ;;  %s241_s24 = smov [#allocation8]   ;;  %s123_s28 = sshll.u32 %s286_s3, 4  ;;  %s124_s28 = int_to_ptr.hbm [resolvable:$true] %s123_s28 }
   0xd   :  { %65 = vmatpush.msra.mxu0 %v64_v0  ;;  %137 = vmatpush.msra.mxu1 %v64_v0  ;;  %v62_v2 = vld [vmem:[#allocation6 + $0x68] sm:$0xff]  ;;  %v61_v3 = vld [vmem:[#allocation6 + $0x60] sm:$0xff]  ;;  %v60_v4 = vld [vmem:[#allocation6 + $0x58] sm:$0xff]  ;;  %s121_s25 = sshll.u32 %s241_s24, 4  ;;  %s122_s25 = int_to_ptr.vmem [resolvable:$true] %s121_s25 }
   0xe   :  { %v59_v5 = vld [vmem:[#allocation6 + $0x50] sm:$0xff]  ;;  %v58_v6 = vld [vmem:[#allocation6 + $0x48] sm:$0xff]  ;;  %v57_v7 = vld [vmem:[#allocation6 + $0x40] sm:$0xff] }
   0xf   :  { %66 = vmatpush.msra.mxu0 %v63_v1  ;;  %138 = vmatpush.msra.mxu1 %v63_v1  ;;  %v56_v8 = vld [vmem:[#allocation6 + $0x38] sm:$0xff]  ;;  %v55_v9 = vld [vmem:[#allocation6 + $0x30] sm:$0xff]  ;;  %v54_v10 = vld [vmem:[#allocation6 + $0x28] sm:$0xff] }
  0x10   :  { %v53_v11 = vld [vmem:[#allocation6 + $0x20] sm:$0xff]  ;;  %v52_v12 = vld [vmem:[#allocation6 + $0x18] sm:$0xff]  ;;  %v51_v13 = vld [vmem:[#allocation6 + $0x10] sm:$0xff] }
  0x11   :  { %67 = vmatpush.msra.mxu0 %v62_v2  ;;  %139 = vmatpush.msra.mxu1 %v62_v2  ;;  %v50_v14 = vld [vmem:[#allocation6 + $0x8] sm:$0xff]  ;;  %v49_v15 = vld [vmem:[#allocation6] sm:$0xff]  ;;  %v47_v16 = vld [vmem:[#allocation3] sm:$0xff] }
  0x12   :  { %v48_v17 = vld [vmem:[#allocation3 + $0x8] sm:$0xff]  ;;  %v158_v18 = vld [vmem:[%s285_s2] ss:$0 sm:$0xff] }
  0x13   :  { %68 = vmatpush.msra.mxu0 %v61_v3  ;;  %140 = vmatpush.msra.mxu1 %v61_v3 }
  0x15   :  { %69 = vmatpush.msra.mxu0 %v60_v4  ;;  %141 = vmatpush.msra.mxu1 %v60_v4 }
  0x17   :  { %70 = vmatpush.msra.mxu0 %v59_v5  ;;  %142 = vmatpush.msra.mxu1 %v59_v5 }
  0x19   :  { %71 = vmatpush.msra.mxu0 %v58_v6  ;;  %143 = vmatpush.msra.mxu1 %v58_v6 }
  0x1b   :  { %72 = vmatpush.msra.mxu0 %v57_v7  ;;  %144 = vmatpush.msra.mxu1 %v57_v7 }
  0x1d   :  { %73 = vmatpush.msra.mxu0 %v56_v8  ;;  %145 = vmatpush.msra.mxu1 %v56_v8 }
  0x1f   :  { %74 = vmatpush.msra.mxu0 %v55_v9  ;;  %146 = vmatpush.msra.mxu1 %v55_v9 }
  0x21   :  { %75 = vmatpush.msra.mxu0 %v54_v10  ;;  %147 = vmatpush.msra.mxu1 %v54_v10 }
  0x23   :  { %76 = vmatpush.msra.mxu0 %v53_v11  ;;  %148 = vmatpush.msra.mxu1 %v53_v11 }
  0x25   :  { %77 = vmatpush.msra.mxu0 %v52_v12  ;;  %149 = vmatpush.msra.mxu1 %v52_v12 }
  0x27   :  { %78 = vmatpush.msra.mxu0 %v51_v13  ;;  %150 = vmatpush.msra.mxu1 %v51_v13 }
  0x29   :  { %79 = vmatpush.msra.mxu0 %v50_v14  ;;  %151 = vmatpush.msra.mxu1 %v50_v14 }
  0x2b   :  { %80 = vmatpush.msra.mxu0 %v49_v15  ;;  %152 = vmatpush.msra.mxu1 %v49_v15 }
  0x2c   :  { %81 = vmatmul.f32.vlgmr.msra.gmra.mxu0 %v47_v16  ;;  %84 = vmatmul.f32.vlgmr.msra.gmra.mxu1 %v48_v17 }
  0xa9   :  { %v82_v19 = vpop.f32.mrf.mxu0  ;;  %v85_v20 = vpop.f32.mrf.mxu1 }
  0xaa   :  { %v113_v21 = vadd.f32 %v158_v18, %v82_v19  ;;  %v114_v22 = vadd.f32 %v158_v18, %v85_v20 }
  0xac   :  { %115 = vst [vmem:[#allocation8] sm:$0xff] %v113_v21 }
  0xad   :  { %116 = vst [vmem:[#allocation8 + $0x8] sm:$0xff] %v114_v22 }
  0xae   :  { %129 = dma.vmem_to_hbm [thread:$0]  %s122_s25, 256, %s124_s28, [#allocation5], %s238_s20, %s238_s20, %s239_s21  }
  0xaf   :  { %235 = dma.done.wait [#allocation5], 256  }
  0xb0   :  { %236 = vsyncadd [#allocation5], 4294967040 }
  0xb1   :  { %134 = vsyncpa [#allocation4], 1 }
  0xb2   :  { %135 = vsyncpa [#allocation7], 1 }
  0xb3   :  { %136 = vsyncpa [#allocation5], 1 }

</bundles_post_ra>
